<compile_context>
chip_gen: v7x
topology: tpu7x:2x2x1
jax: 0.10.0
libtpu: 0.0.40
codegen_flags: <defaults>
</compile_context>

<pallas_src>
import jax
import jax.numpy as jnp
from jax.experimental import pallas as pl
from jax.experimental.pallas import tpu as pltpu


def _round_up(x, m):
    return (x + m - 1) // m * m


def _refiner_kernel(xt_ref, yt_ref,
                    wxT_ref, bx_ref,
                    wyT_ref, by_ref,
                    w1aT_ref, w1bT_ref, b1_ref,
                    w2T_ref, b2_ref,
                    out_ref):
    # hX^T = tanh(Wx^T @ X^T + bx)   -> (hid_p, tile_n), lanes = tile_n (dense)
    hx = jnp.tanh(
        jnp.dot(wxT_ref[...], xt_ref[...], preferred_element_type=jnp.float32)
        + bx_ref[...]).astype(jnp.bfloat16)

    # hY^T = tanh(Wy^T @ Y^T + by)
    hy = jnp.tanh(
        jnp.dot(wyT_ref[...], yt_ref[...], preferred_element_type=jnp.float32)
        + by_ref[...]).astype(jnp.bfloat16)

    # concat([hX, hY]) @ W1  ==  W1[:hid]^T @ hX^T + W1[hid:]^T @ hY^T
    # (weights pre-split in the wrapper -> no in-kernel concat copy).
    h = jnp.tanh(
        jnp.dot(w1aT_ref[...], hx, preferred_element_type=jnp.float32)
        + jnp.dot(w1bT_ref[...], hy, preferred_element_type=jnp.float32)
        + b1_ref[...]).astype(jnp.bfloat16)

    # out^T = sigmoid(W2^T @ h^T + b2)  -> (H*F, tile_n) lane-dense store.
    logits = (jnp.dot(w2T_ref[...], h, preferred_element_type=jnp.float32)
              + b2_ref[...])
    out_ref[...] = jax.nn.sigmoid(logits).astype(out_ref.dtype)


def refiner_forward(X, Y, params, lookback, horizon, feature_dim, *, tile_n=1024):
    L, N, F = X.shape
    H = Y.shape[0]
    assert (L, F) == (lookback, feature_dim) and H == horizon
    LF, HF = L * F, H * F

    hid = params["wx"].shape[1]
    hid_p = _round_up(hid, 128)          # pad hidden dim to dense lane/MXU width
    ph = hid_p - hid

    # ---- one-time weight preprocessing (tiny, outside the kernel) -----------
    # Weights are stored transposed so every in-kernel GEMM has tile_n in the
    # lane (minor) dimension.  The hid zero-padding is numerically exact:
    # tanh(0)=0 rows feed zero columns of the next layer.
    wxT = jnp.pad(params["wx"].T, ((0, ph), (0, 0))).astype(jnp.bfloat16)      # (hid_p, L*F)
    wyT = jnp.pad(params["wy"].T, ((0, ph), (0, 0))).astype(jnp.bfloat16)      # (hid_p, H*F)
    bx = jnp.pad(params["bx"].reshape(hid, 1), ((0, ph), (0, 0))).astype(jnp.float32)
    by = jnp.pad(params["by"].reshape(hid, 1), ((0, ph), (0, 0))).astype(jnp.float32)
    w1 = params["w1"]
    w1aT = jnp.pad(w1[:hid].T, ((0, ph), (0, ph))).astype(jnp.bfloat16)        # (hid_p, hid_p)
    w1bT = jnp.pad(w1[hid:].T, ((0, ph), (0, ph))).astype(jnp.bfloat16)        # (hid_p, hid_p)
    b1 = jnp.pad(params["b1"].reshape(hid, 1), ((0, ph), (0, 0))).astype(jnp.float32)
    w2T = jnp.pad(params["w2"].T, ((0, 0), (0, ph))).astype(jnp.bfloat16)      # (H*F, hid_p)
    b2 = params["b2"].reshape(HF, 1).astype(jnp.float32)

    # ---- lane-dense activation relayout, folded into the bf16 cast ----------
    # X (L,N,F) -> (L,F,N) -> (L*F, N): column n is one sample; lanes = N.
    Xt = jnp.transpose(X, (0, 2, 1)).reshape(LF, N).astype(jnp.bfloat16)
    Yt = jnp.transpose(Y, (0, 2, 1)).reshape(HF, N).astype(jnp.bfloat16)

    # ---- tile the batch/node dim (no tail padding; last block may be partial)
    if N <= tile_n:
        tn = N                                    # single block, full extent
    else:
        # 128-multiple lane tile; ensure >=2 balanced grid steps so a 2-TC chip
        # (v7x megacore) keeps both cores busy for medium N.
        tn = min(tile_n, max(128, _round_up(pl.cdiv(N, 2), 128)))
    grid = (pl.cdiv(N, tn),)

    data_spec = lambda rows: pl.BlockSpec((rows, tn), lambda i: (0, i))
    const_spec = lambda shape: pl.BlockSpec(shape, lambda i: (0, 0))

    flops = 2 * N * (LF * hid_p + HF * hid_p + 2 * hid_p * hid_p + hid_p * HF)
    transcendentals = N * (3 * hid_p + HF)
    bytes_accessed = (N * ((LF + HF) * 2 + HF * 2)
                      + 2 * (wxT.size + wyT.size + w1aT.size + w1bT.size + w2T.size)
                      + 4 * (bx.size + by.size + b1.size + b2.size))

    out_t = pl.pallas_call(
        _refiner_kernel,
        out_shape=jax.ShapeDtypeStruct((HF, N), jnp.bfloat16),
        grid_spec=pltpu.PrefetchScalarGridSpec(
            num_scalar_prefetch=0,
            grid=grid,
            in_specs=[
                data_spec(LF),                 # X^T  (L*F, N)   streamed, pipelined
                data_spec(HF),                 # Y^T  (H*F, N)   streamed, pipelined
                const_spec((hid_p, LF)),       # Wx^T            VMEM-resident
                const_spec((hid_p, 1)),        # bx
                const_spec((hid_p, HF)),       # Wy^T
                const_spec((hid_p, 1)),        # by
                const_spec((hid_p, hid_p)),    # W1[:hid]^T
                const_spec((hid_p, hid_p)),    # W1[hid:]^T
                const_spec((hid_p, 1)),        # b1
                const_spec((HF, hid_p)),       # W2^T
                const_spec((HF, 1)),           # b2
            ],
            out_specs=pl.BlockSpec((HF, tn), lambda i: (0, i)),
        ),
        compiler_params=pltpu.CompilerParams(
            dimension_semantics=("parallel",)),
        cost_estimate=pl.CostEstimate(flops=flops,
                                      transcendentals=transcendentals,
                                      bytes_accessed=bytes_accessed),
    )(Xt, Yt, wxT, bx, wyT, by, w1aT, w1bT, b1, w2T, b2)

    # (H*F, N) -> (H, N, F); this relayout pass also carries the f32 upcast.
    return jnp.transpose(out_t.reshape(H, F, N), (0, 2, 1)).astype(jnp.float32)


def init_params(key, lookback, horizon, feature_dim, hid_dim):
    """Deterministic synthetic parameters (shapes match the nn.Linear layers)."""
    ks = jax.random.split(key, 8)
    lf, hf = lookback * feature_dim, horizon * feature_dim
    scale = 0.1
    return {
        # mlp_X: Linear(L*F -> hid)
        "wx": scale * jax.random.normal(ks[0], (lf, hid_dim), jnp.float32),
        "bx": scale * jax.random.normal(ks[1], (hid_dim,), jnp.float32),
        # mlp_Y: Linear(H*F -> hid)
        "wy": scale * jax.random.normal(ks[2], (hf, hid_dim), jnp.float32),
        "by": scale * jax.random.normal(ks[3], (hid_dim,), jnp.float32),
        # mlp_out[0]: Linear(2*hid -> hid)
        "w1": scale * jax.random.normal(ks[4], (2 * hid_dim, hid_dim), jnp.float32),
        "b1": scale * jax.random.normal(ks[5], (hid_dim,), jnp.float32),
        # mlp_out[3]: Linear(hid -> H*F)
        "w2": scale * jax.random.normal(ks[6], (hid_dim, hf), jnp.float32),
        "b2": scale * jax.random.normal(ks[7], (hf,), jnp.float32),
    }


def reference_forward(X, Y, params, lookback, horizon, feature_dim):
    """Pure-JAX f32 reference (matches the PyTorch forward in eval mode)."""
    N = X.shape[1]
    Xf = jnp.transpose(X, (1, 0, 2)).reshape(N, lookback * feature_dim)
    Yf = jnp.transpose(Y, (1, 0, 2)).reshape(N, horizon * feature_dim)
    hx = jnp.tanh(Xf @ params["wx"] + params["bx"])
    hy = jnp.tanh(Yf @ params["wy"] + params["by"])
    cat = jnp.concatenate([hx, hy], axis=-1)
    h = jnp.tanh(cat @ params["w1"] + params["b1"])
    out = jax.nn.sigmoid(h @ params["w2"] + params["b2"])
    return jnp.transpose(out.reshape(N, horizon, feature_dim), (1, 0, 2))


if __name__ == "__main__":
    lookback, horizon, feature_dim, hid_dim = 4, 3, 4, 32

    key = jax.random.PRNGKey(0)
    kx, ky, kp = jax.random.split(key, 3)
    params = init_params(kp, lookback, horizon, feature_dim, hid_dim)

    # Small single-tile case + a multi-tile case with ragged N (exercises the
    # grid, the partial final block, and the megacore-parallel path).
    for N in (8, 1040):
        kxn, kyn = jax.random.split(jax.random.fold_in(kx, N))
        X = jax.random.normal(kxn, (lookback, N, feature_dim), jnp.float32)
        Y = jax.random.normal(kyn, (horizon, N, feature_dim), jnp.float32)

        out = refiner_forward(X, Y, params, lookback, horizon, feature_dim,
                              tile_n=1024)
        out = jax.block_until_ready(out)

        ref = reference_forward(X, Y, params, lookback, horizon, feature_dim)
        assert out.shape == (horizon, N, feature_dim)
        # bf16 activation/weight/output streams -> loosened tolerance vs f32 ref.
        assert jnp.allclose(out, ref, atol=1e-2, rtol=1e-2), (
            f"mismatch vs pure-JAX reference (N={N}, "
            f"max abs err {jnp.max(jnp.abs(out - ref)):.3e})")

    print("KERNEL_OK")
</pallas_src>

<mosaic_0001>
module attributes {stable_mosaic.version = 11 : i64} {
  func.func @_refiner_kernel(%arg0: i32, %arg1: memref<16x8xbf16, #tpu.memory_space<vmem>>, %arg2: memref<12x8xbf16, #tpu.memory_space<vmem>>, %arg3: memref<128x16xbf16, #tpu.memory_space<vmem>>, %arg4: memref<128x1xf32, #tpu.memory_space<vmem>>, %arg5: memref<128x12xbf16, #tpu.memory_space<vmem>>, %arg6: memref<128x1xf32, #tpu.memory_space<vmem>>, %arg7: memref<128x128xbf16, #tpu.memory_space<vmem>>, %arg8: memref<128x128xbf16, #tpu.memory_space<vmem>>, %arg9: memref<128x1xf32, #tpu.memory_space<vmem>>, %arg10: memref<12x128xbf16, #tpu.memory_space<vmem>>, %arg11: memref<12x1xf32, #tpu.memory_space<vmem>>, %arg12: memref<12x8xbf16, #tpu.memory_space<vmem>>) attributes {dimension_semantics = [#tpu.dimension_semantics<parallel>], iteration_bounds = array<i64: 1>, scalar_prefetch = 0 : i64, scratch_operands = 0 : i64, tpu.core_type = #tpu.core_type<tc>, window_params = [{transform_indices = @transform_0, window_bounds = array<i64: 16, 8>}, {transform_indices = @transform_1, window_bounds = array<i64: 12, 8>}, {pipeline_mode = #tpu.pipeline_mode<synchronous>, transform_indices = @transform_2, window_bounds = array<i64: 128, 16>}, {pipeline_mode = #tpu.pipeline_mode<synchronous>, transform_indices = @transform_3, window_bounds = array<i64: 128, 1>}, {pipeline_mode = #tpu.pipeline_mode<synchronous>, transform_indices = @transform_4, window_bounds = array<i64: 128, 12>}, {pipeline_mode = #tpu.pipeline_mode<synchronous>, transform_indices = @transform_5, window_bounds = array<i64: 128, 1>}, {pipeline_mode = #tpu.pipeline_mode<synchronous>, transform_indices = @transform_6, window_bounds = array<i64: 128, 128>}, {pipeline_mode = #tpu.pipeline_mode<synchronous>, transform_indices = @transform_7, window_bounds = array<i64: 128, 128>}, {pipeline_mode = #tpu.pipeline_mode<synchronous>, transform_indices = @transform_8, window_bounds = array<i64: 128, 1>}, {pipeline_mode = #tpu.pipeline_mode<synchronous>, transform_indices = @transform_9, window_bounds = array<i64: 12, 128>}, {pipeline_mode = #tpu.pipeline_mode<synchronous>, transform_indices = @transform_10, window_bounds = array<i64: 12, 1>}, {transform_indices = @transform_11, window_bounds = array<i64: 12, 8>}]} {
    %c0 = arith.constant 0 : index
    %c0_0 = arith.constant 0 : index
    %0 = vector.load %arg3[%c0, %c0_0] : memref<128x16xbf16, #tpu.memory_space<vmem>>, vector<128x16xbf16>
    %c0_1 = arith.constant 0 : index
    %c0_2 = arith.constant 0 : index
    %1 = vector.load %arg1[%c0_1, %c0_2] : memref<16x8xbf16, #tpu.memory_space<vmem>>, vector<16x8xbf16>
    %cst = arith.constant dense<0.000000e+00> : vector<128x8xf32>
    %2 = tpu.matmul %0, %1, %cst {dimension_numbers = #tpu.dot_dimension_numbers<[1], [0], [0], [1], [0, 0, 1, 1], [], []>} : vector<128x16xbf16>, vector<16x8xbf16>, vector<128x8xf32> -> vector<128x8xf32>
    %c0_3 = arith.constant 0 : index
    %c0_4 = arith.constant 0 : index
    %3 = vector.load %arg4[%c0_3, %c0_4] : memref<128x1xf32, #tpu.memory_space<vmem>>, vector<128x1xf32>
    %4 = vector.broadcast %3 : vector<128x1xf32> to vector<128x8xf32>
    %5 = arith.addf %2, %4 : vector<128x8xf32>
    %6 = math.tanh %5 : vector<128x8xf32>
    %7 = arith.truncf %6 : vector<128x8xf32> to vector<128x8xbf16>
    %c0_5 = arith.constant 0 : index
    %c0_6 = arith.constant 0 : index
    %8 = vector.load %arg5[%c0_5, %c0_6] : memref<128x12xbf16, #tpu.memory_space<vmem>>, vector<128x12xbf16>
    %c0_7 = arith.constant 0 : index
    %c0_8 = arith.constant 0 : index
    %9 = vector.load %arg2[%c0_7, %c0_8] : memref<12x8xbf16, #tpu.memory_space<vmem>>, vector<12x8xbf16>
    %cst_9 = arith.constant dense<0.000000e+00> : vector<128x8xf32>
    %10 = tpu.matmul %8, %9, %cst_9 {dimension_numbers = #tpu.dot_dimension_numbers<[1], [0], [0], [1], [0, 0, 1, 1], [], []>} : vector<128x12xbf16>, vector<12x8xbf16>, vector<128x8xf32> -> vector<128x8xf32>
    %c0_10 = arith.constant 0 : index
    %c0_11 = arith.constant 0 : index
    %11 = vector.load %arg6[%c0_10, %c0_11] : memref<128x1xf32, #tpu.memory_space<vmem>>, vector<128x1xf32>
    %12 = vector.broadcast %11 : vector<128x1xf32> to vector<128x8xf32>
    %13 = arith.addf %10, %12 : vector<128x8xf32>
    %14 = math.tanh %13 : vector<128x8xf32>
    %15 = arith.truncf %14 : vector<128x8xf32> to vector<128x8xbf16>
    %c0_12 = arith.constant 0 : index
    %c0_13 = arith.constant 0 : index
    %16 = vector.load %arg7[%c0_12, %c0_13] : memref<128x128xbf16, #tpu.memory_space<vmem>>, vector<128x128xbf16>
    %cst_14 = arith.constant dense<0.000000e+00> : vector<128x8xf32>
    %17 = tpu.matmul %16, %7, %cst_14 {dimension_numbers = #tpu.dot_dimension_numbers<[1], [0], [0], [1], [0, 0, 1, 1], [], []>} : vector<128x128xbf16>, vector<128x8xbf16>, vector<128x8xf32> -> vector<128x8xf32>
    %c0_15 = arith.constant 0 : index
    %c0_16 = arith.constant 0 : index
    %18 = vector.load %arg8[%c0_15, %c0_16] : memref<128x128xbf16, #tpu.memory_space<vmem>>, vector<128x128xbf16>
    %cst_17 = arith.constant dense<0.000000e+00> : vector<128x8xf32>
    %19 = tpu.matmul %18, %15, %cst_17 {dimension_numbers = #tpu.dot_dimension_numbers<[1], [0], [0], [1], [0, 0, 1, 1], [], []>} : vector<128x128xbf16>, vector<128x8xbf16>, vector<128x8xf32> -> vector<128x8xf32>
    %20 = arith.addf %17, %19 : vector<128x8xf32>
    %c0_18 = arith.constant 0 : index
    %c0_19 = arith.constant 0 : index
    %21 = vector.load %arg9[%c0_18, %c0_19] : memref<128x1xf32, #tpu.memory_space<vmem>>, vector<128x1xf32>
    %22 = vector.broadcast %21 : vector<128x1xf32> to vector<128x8xf32>
    %23 = arith.addf %20, %22 : vector<128x8xf32>
    %24 = math.tanh %23 : vector<128x8xf32>
    %25 = arith.truncf %24 : vector<128x8xf32> to vector<128x8xbf16>
    %c0_20 = arith.constant 0 : index
    %c0_21 = arith.constant 0 : index
    %26 = vector.load %arg10[%c0_20, %c0_21] : memref<12x128xbf16, #tpu.memory_space<vmem>>, vector<12x128xbf16>
    %cst_22 = arith.constant dense<0.000000e+00> : vector<12x8xf32>
    %27 = tpu.matmul %26, %25, %cst_22 {dimension_numbers = #tpu.dot_dimension_numbers<[1], [0], [0], [1], [0, 0, 1, 1], [], []>} : vector<12x128xbf16>, vector<128x8xbf16>, vector<12x8xf32> -> vector<12x8xf32>
    %c0_23 = arith.constant 0 : index
    %c0_24 = arith.constant 0 : index
    %28 = vector.load %arg11[%c0_23, %c0_24] : memref<12x1xf32, #tpu.memory_space<vmem>>, vector<12x1xf32>
    %29 = vector.broadcast %28 : vector<12x1xf32> to vector<12x8xf32>
    %30 = arith.addf %27, %29 : vector<12x8xf32>
    %31 = arith.negf %30 : vector<12x8xf32>
    %32 = math.exp %31 : vector<12x8xf32>
    %cst_25 = arith.constant 1.000000e+00 : f32
    %33 = vector.broadcast %cst_25 : f32 to vector<12x8xf32>
    %34 = arith.addf %33, %32 : vector<12x8xf32>
    %35 = arith.divf %33, %34 : vector<12x8xf32>
    %36 = arith.truncf %35 : vector<12x8xf32> to vector<12x8xbf16>
    %c0_26 = arith.constant 0 : index
    %c0_27 = arith.constant 0 : index
    %37 = vector.load %arg12[%c0_26, %c0_27] : memref<12x8xbf16, #tpu.memory_space<vmem>>, vector<12x8xbf16>
    tpu.vector_store %arg12[%c0_26, %c0_27], %36 {strides = array<i32>} : memref<12x8xbf16, #tpu.memory_space<vmem>>, vector<12x8xbf16>,
    return
  }
  func.func @transform_0(%arg0: i32) -> (i32, i32) {
    %c0_i32 = arith.constant 0 : i32
    %c0_i32_0 = arith.constant 0 : i32
    return %c0_i32, %arg0 : i32, i32
  }
  func.func @transform_1(%arg0: i32) -> (i32, i32) {
    %c0_i32 = arith.constant 0 : i32
    %c0_i32_0 = arith.constant 0 : i32
    return %c0_i32, %arg0 : i32, i32
  }
  func.func @transform_2(%arg0: i32) -> (i32, i32) {
    %c0_i32 = arith.constant 0 : i32
    %c0_i32_0 = arith.constant 0 : i32
    %c0_i32_1 = arith.constant 0 : i32
    return %c0_i32, %c0_i32_0 : i32, i32
  }
  func.func @transform_3(%arg0: i32) -> (i32, i32) {
    %c0_i32 = arith.constant 0 : i32
    %c0_i32_0 = arith.constant 0 : i32
    %c0_i32_1 = arith.constant 0 : i32
    return %c0_i32, %c0_i32_0 : i32, i32
  }
  func.func @transform_4(%arg0: i32) -> (i32, i32) {
    %c0_i32 = arith.constant 0 : i32
    %c0_i32_0 = arith.constant 0 : i32
    %c0_i32_1 = arith.constant 0 : i32
    return %c0_i32, %c0_i32_0 : i32, i32
  }
  func.func @transform_5(%arg0: i32) -> (i32, i32) {
    %c0_i32 = arith.constant 0 : i32
    %c0_i32_0 = arith.constant 0 : i32
    %c0_i32_1 = arith.constant 0 : i32
    return %c0_i32, %c0_i32_0 : i32, i32
  }
  func.func @transform_6(%arg0: i32) -> (i32, i32) {
    %c0_i32 = arith.constant 0 : i32
    %c0_i32_0 = arith.constant 0 : i32
    %c0_i32_1 = arith.constant 0 : i32
    return %c0_i32, %c0_i32_0 : i32, i32
  }
  func.func @transform_7(%arg0: i32) -> (i32, i32) {
    %c0_i32 = arith.constant 0 : i32
    %c0_i32_0 = arith.constant 0 : i32
    %c0_i32_1 = arith.constant 0 : i32
    return %c0_i32, %c0_i32_0 : i32, i32
  }
  func.func @transform_8(%arg0: i32) -> (i32, i32) {
    %c0_i32 = arith.constant 0 : i32
    %c0_i32_0 = arith.constant 0 : i32
    %c0_i32_1 = arith.constant 0 : i32
    return %c0_i32, %c0_i32_0 : i32, i32
  }
  func.func @transform_9(%arg0: i32) -> (i32, i32) {
    %c0_i32 = arith.constant 0 : i32
    %c0_i32_0 = arith.constant 0 : i32
    %c0_i32_1 = arith.constant 0 : i32
    return %c0_i32, %c0_i32_0 : i32, i32
  }
  func.func @transform_10(%arg0: i32) -> (i32, i32) {
    %c0_i32 = arith.constant 0 : i32
    %c0_i32_0 = arith.constant 0 : i32
    %c0_i32_1 = arith.constant 0 : i32
    return %c0_i32, %c0_i32_0 : i32, i32
  }
  func.func @transform_11(%arg0: i32) -> (i32, i32) {
    %c0_i32 = arith.constant 0 : i32
    %c0_i32_0 = arith.constant 0 : i32
    return %c0_i32, %arg0 : i32, i32
  }
}

</mosaic_0001>

<bundles_post_ra>
// kernel: tpu_custom_call.1
= control target key start
LH: loop header
LB: loop body
LE: loop exit
PB: predicated region body
PF: predicated region fallthrough
CT: control target
= control target key end

     0   :  { %v1598_v0 = vmov 0   ;;  %vm529_vm0 = vcmask 1045504   ;;  %vm199_vm1 = vcmask 130048   ;;  %vm504_vm2 = vcmask 97280   ;;  %s1989_s5 = inlined_call_operand.vmem [shape: f32[128,1], index: 5, kind: input, shape index: {}]   ;;  %s1990_s3 = inlined_call_operand.vmem [shape: f32[128,1], index: 3, kind: input, shape index: {}]   ;;  %s1991_s0 = inlined_call_operand.vmem [shape: bf16[16,8], index: 0, kind: input, shape index: {}]   ;;  %s1992_s1 = inlined_call_operand.vmem [shape: bf16[12,8], index: 1, kind: input, shape index: {}]   ;;  %s1993_s2 = inlined_call_operand.vmem [shape: bf16[128,16], index: 2, kind: input, shape index: {}]   ;;  %s1994_s4 = inlined_call_operand.vmem [shape: bf16[128,12], index: 4, kind: input, shape index: {}]   ;;  %s1995_s8 = inlined_call_operand.vmem [shape: f32[128,1], index: 8, kind: input, shape index: {}]   ;;  %s1996_s10 = inlined_call_operand.vmem [shape: f32[12,1], index: 10, kind: input, shape index: {}]   ;;  %s1997_s7 = inlined_call_operand.vmem [shape: bf16[128,128], index: 7, kind: input, shape index: {}]   ;;  %s1998_s6 = inlined_call_operand.vmem [shape: bf16[128,128], index: 6, kind: input, shape index: {}]   ;;  %s1999_s9 = inlined_call_operand.vmem [shape: bf16[12,128], index: 9, kind: input, shape index: {}]   ;;  %s2000_s11 = inlined_call_operand.vmem [shape: bf16[12,8], index: 11, kind: output, shape index: {}]  }
   0x1   :  { %1458 = vset.pattern.permute.xlu1 %v1598_v0  ;;  %1457 = vset.pattern.permute.xlu0 %v1598_v0  ;;  %v363_v1 = vld [vmem:[%s1989_s5] sm:$0xff]  ;;  %v364_v5 = vld [vmem:[%s1989_s5 + $0x8] sm:$0xff]  ;;  %v60_v12 = vld [vmem:[%s1990_s3 + $0x18] sm:$0xff]  ;;  %vm1600_vm3 = vmmov 0   ;;  %vm1193_vm4 = vcmask 60416   ;;  %vm1195_vm5 = vcmask 58368  }
   0x2   :  { %v57_v2 = vld [vmem:[%s1990_s3] sm:$0xff]  ;;  %381 = vperm.xlu1 %1458, %v363_v1   ;;  %v58_v6 = vld [vmem:[%s1990_s3 + $0x8] sm:$0xff]  ;;  %v59_v13 = vld [vmem:[%s1990_s3 + $0x10] sm:$0xff] }
   0x3   :  { %75 = vperm.xlu0 %1457, %v57_v2   ;;  %v1459_v3 = vld [vmem:[%s1991_s0] sm:$0xff]   ;;  %v1463_v10 = vld [vmem:[%s1993_s2 + $0x8] sm:$0xff]   ;;  %v366_v14 = vld [vmem:[%s1989_s5 + $0x18] sm:$0xff] }
   0x4   :  { %v1460_v4 = vld [vmem:[%s1992_s1] sm:$0x3f]   ;;  %1317 = vmatprep.subr.bf16.mxu0 %v1459_v3  ;;  %v1464_v11 = vld [vmem:[%s1994_s4 + $0x8] sm:$0xff]   ;;  %v1465_v15 = vld [vmem:[%s1993_s2 + $0x10] sm:$0xff]  }
   0x5   :  { %1453 = vmatprep.subr.msk.bf16.mxu1 %vm529_vm0, %v1460_v4  ;;  %1318 = vmatpush3.bf16.msra.mxu0 %v1459_v3  ;;  %v531_v7 = vsel %vm529_vm0, %v1460_v4, 0  ;;  %v1461_v8 = vld [vmem:[%s1993_s2] sm:$0xff]   ;;  %v1466_v16 = vld [vmem:[%s1994_s4 + $0x10] sm:$0xff]   ;;  %v1467_v18 = vld [vmem:[%s1993_s2 + $0x18] sm:$0xff]  }
   0x6   :  { %1336 = vmatpush3.bf16.msra.mxu1 %v531_v7  ;;  %386 = vperm.xlu1 %1458, %v364_v5   ;;  %v1462_v9 = vld [vmem:[%s1994_s4] sm:$0xff]   ;;  %v365_v17 = vld [vmem:[%s1989_s5 + $0x10] sm:$0xff]  ;;  %v1468_v19 = vld [vmem:[%s1994_s4 + $0x18] sm:$0xff]  }
   0x7   :  { %80 = vperm.xlu0 %1457, %v58_v6   ;;  %1319 = vmatprep.mubr.msk.bf16.mxu0 %vm199_vm1, %v1461_v8  ;;  %v62_v20 = vld [vmem:[%s1990_s3 + $0x28] sm:$0xff]  ;;  %v61_v21 = vld [vmem:[%s1990_s3 + $0x20] sm:$0xff]  ;;  %v64_v28 = vld [vmem:[%s1990_s3 + $0x38] sm:$0xff] }
   0x8   :  { %1337 = vmatprep.mubr.msk.bf16.mxu1 %vm504_vm2, %v1462_v9  ;;  %1320 = vmatmul.mubr.msk.bf16.vlgmr.msra.gmra.mrb[0].mxu0 %vm199_vm1, %v1463_v10  ;;  %v1469_v22 = vld [vmem:[%s1993_s2 + $0x20] sm:$0xff]   ;;  %v368_v24 = vld [vmem:[%s1989_s5 + $0x28] sm:$0xff]  ;;  %v1473_v29 = vld [vmem:[%s1993_s2 + $0x30] sm:$0xff]  }
   0x9   :  { %1338 = vmatmul.mubr.msk.bf16.vlgmr.msra.gmra.mrb[0].mxu1 %vm504_vm2, %v1464_v11  ;;  %1323 = vmatprep.mubr.msk.bf16.mxu0 %vm199_vm1, %v1465_v15  ;;  %v1470_v23 = vld [vmem:[%s1994_s4 + $0x20] sm:$0xff]   ;;  %v1471_v26 = vld [vmem:[%s1993_s2 + $0x28] sm:$0xff]   ;;  %v63_v30 = vld [vmem:[%s1990_s3 + $0x30] sm:$0xff] }
   0xa   :  { %90 = vperm.xlu1 %1458, %v60_v12   ;;  %1341 = vmatprep.mubr.msk.bf16.mxu1 %vm504_vm2, %v1466_v16  ;;  %v367_v25 = vld [vmem:[%s1989_s5 + $0x20] sm:$0xff]  ;;  %v1472_v27 = vld [vmem:[%s1994_s4 + $0x28] sm:$0xff]   ;;  %v1474_v31 = vld [vmem:[%s1994_s4 + $0x30] sm:$0xff]  }
   0xb   :  { %85 = vperm.xlu0 %1457, %v59_v13   ;;  %v370_v32 = vld [vmem:[%s1989_s5 + $0x38] sm:$0xff]  ;;  %v369_v33 = vld [vmem:[%s1989_s5 + $0x30] sm:$0xff]  ;;  %v66_v36 = vld [vmem:[%s1990_s3 + $0x48] sm:$0xff] }
   0xc   :  { %v1475_v34 = vld [vmem:[%s1993_s2 + $0x38] sm:$0xff]   ;;  %v65_v37 = vld [vmem:[%s1990_s3 + $0x40] sm:$0xff]  ;;  %v372_v38 = vld [vmem:[%s1989_s5 + $0x48] sm:$0xff] }
   0xd   :  { %v1476_v35 = vld [vmem:[%s1994_s4 + $0x38] sm:$0xff]   ;;  %v371_v39 = vld [vmem:[%s1989_s5 + $0x40] sm:$0xff]  ;;  %v67_v41 = vld [vmem:[%s1990_s3 + $0x50] sm:$0xff] }
   0xe   :  { %396 = vperm.xlu1 %1458, %v366_v14   ;;  %v68_v40 = vld [vmem:[%s1990_s3 + $0x58] sm:$0xff]  ;;  %v373_v43 = vld [vmem:[%s1989_s5 + $0x50] sm:$0xff]  ;;  %v70_v44 = vld [vmem:[%s1990_s3 + $0x68] sm:$0xff] }
   0xf   :  { %391 = vperm.xlu0 %1457, %v365_v17   ;;  %v374_v42 = vld [vmem:[%s1989_s5 + $0x58] sm:$0xff]  ;;  %v69_v45 = vld [vmem:[%s1990_s3 + $0x60] sm:$0xff]  ;;  %v376_v46 = vld [vmem:[%s1989_s5 + $0x68] sm:$0xff] }
  0x10   :  { %1324 = vmatmul.mubr.msk.bf16.gmra.mrb[4].mxu0 %vm199_vm1, %v1467_v18  ;;  %v375_v47 = vld [vmem:[%s1989_s5 + $0x60] sm:$0xff]  ;;  %v72_v48 = vld [vmem:[%s1990_s3 + $0x78] sm:$0xff]  ;;  %v71_v49 = vld [vmem:[%s1990_s3 + $0x70] sm:$0xff] }
  0x11   :  { %1342 = vmatmul.mubr.msk.bf16.gmra.mrb[4].mxu1 %vm504_vm2, %v1468_v19  ;;  %1327 = vmatprep.mubr.msk.bf16.mxu0 %vm199_vm1, %v1469_v22  ;;  %v378_v50 = vld [vmem:[%s1989_s5 + $0x78] sm:$0xff]  ;;  %v377_v51 = vld [vmem:[%s1989_s5 + $0x70] sm:$0xff]  ;;  %v977_v52 = vld [vmem:[%s1995_s8 + $0x8] sm:$0xff] }
  0x12   :  { %100 = vperm.xlu1 %1458, %v62_v20   ;;  %1345 = vmatprep.mubr.msk.bf16.mxu1 %vm504_vm2, %v1470_v23  ;;  %v976_v53 = vld [vmem:[%s1995_s8] sm:$0xff]  ;;  %v979_v54 = vld [vmem:[%s1995_s8 + $0x18] sm:$0xff]  ;;  %v978_v55 = vld [vmem:[%s1995_s8 + $0x10] sm:$0xff] }
  0x13   :  { %95 = vperm.xlu0 %1457, %v61_v21   ;;  %v981_v56 = vld [vmem:[%s1995_s8 + $0x28] sm:$0xff]  ;;  %v980_v57 = vld [vmem:[%s1995_s8 + $0x20] sm:$0xff]  ;;  %v983_v58 = vld [vmem:[%s1995_s8 + $0x38] sm:$0xff] }
  0x14   :  { %v982_v59 = vld [vmem:[%s1995_s8 + $0x30] sm:$0xff]  ;;  %v985_v60 = vld [vmem:[%s1995_s8 + $0x48] sm:$0xff]  ;;  %v984_v61 = vld [vmem:[%s1995_s8 + $0x40] sm:$0xff] }
  0x15   :  { %v987_v62 = vld [vmem:[%s1995_s8 + $0x58] sm:$0xff]  ;;  %v986_v63 = vld [vmem:[%s1995_s8 + $0x50] sm:$0xff]  ;;  %v989_v0 = vld [vmem:[%s1995_s8 + $0x68] sm:$0xff] }
  0x16   :  { %406 = vperm.xlu1 %1458, %v368_v24   ;;  %v988_v1 = vld [vmem:[%s1995_s8 + $0x60] sm:$0xff]  ;;  %v991_v2 = vld [vmem:[%s1995_s8 + $0x78] sm:$0xff]  ;;  %v990_v3 = vld [vmem:[%s1995_s8 + $0x70] sm:$0xff] }
  0x17   :  { %401 = vperm.xlu0 %1457, %v367_v25   ;;  %v1115_v4 = vld [vmem:[%s1996_s10 + $0x8] sm:$0xf]  ;;  %v1114_v5 = vld [vmem:[%s1996_s10] sm:$0xff] }
  0x18   :  { %1328 = vmatmul.mubr.msk.bf16.gmra.mrb[8].mxu0 %vm199_vm1, %v1471_v26  ;;  %v1477_v6 = vld [vmem:[%s1997_s7] sm:$0xff]  }
  0x19   :  { %1346 = vmatmul.mubr.msk.bf16.gmra.mrb[8].mxu1 %vm504_vm2, %v1472_v27  ;;  %1331 = vmatprep.mubr.msk.bf16.mxu0 %vm199_vm1, %v1473_v29  ;;  %v1478_v7 = vld [vmem:[%s1998_s6] sm:$0xff]  }
  0x1a   :  { %110 = vperm.xlu1 %1458, %v64_v28   ;;  %1349 = vmatprep.mubr.msk.bf16.mxu1 %vm504_vm2, %v1474_v31 }
  0x1b   :  { %105 = vperm.xlu0 %1457, %v63_v30  }
  0x1e   :  { %416 = vperm.xlu1 %1458, %v370_v32  }
  0x1f   :  { %411 = vperm.xlu0 %1457, %v369_v33  }
  0x20   :  { %1332 = vmatmul.mubr.msk.bf16.gmra.mrb[12].mxu0 %vm199_vm1, %v1475_v34 }
  0x21   :  { %1350 = vmatmul.mubr.msk.bf16.gmra.mrb[12].mxu1 %vm504_vm2, %v1476_v35  ;;  %1401 = vmatprep.mubr.bf16.mxu0 %v1478_v7 }
  0x22   :  { %120 = vperm.xlu1 %1458, %v66_v36   ;;  %1369 = vmatprep.mubr.bf16.mxu1 %v1477_v6 }
  0x23   :  { %115 = vperm.xlu0 %1457, %v65_v37  }
  0x26   :  { %426 = vperm.xlu1 %1458, %v372_v38  }
  0x27   :  { %421 = vperm.xlu0 %1457, %v371_v39  }
  0x2a   :  { %130 = vperm.xlu1 %1458, %v68_v40  }
  0x2b   :  { %125 = vperm.xlu0 %1457, %v67_v41  }
  0x2e   :  { %436 = vperm.xlu1 %1458, %v374_v42  }
  0x2f   :  { %431 = vperm.xlu0 %1457, %v373_v43  }
  0x32   :  { %140 = vperm.xlu1 %1458, %v70_v44  }
  0x33   :  { %135 = vperm.xlu0 %1457, %v69_v45  }
  0x36   :  { %446 = vperm.xlu1 %1458, %v376_v46  }
  0x37   :  { %441 = vperm.xlu0 %1457, %v375_v47  }
  0x3a   :  { %150 = vperm.xlu1 %1458, %v72_v48  }
  0x3b   :  { %145 = vperm.xlu0 %1457, %v71_v49  }
  0x3e   :  { %456 = vperm.xlu1 %1458, %v378_v50  }
  0x3f   :  { %451 = vperm.xlu0 %1457, %v377_v51  }
  0x42   :  { %999 = vperm.xlu1 %1458, %v977_v52  }
  0x43   :  { %994 = vperm.xlu0 %1457, %v976_v53  }
  0x46   :  { %1009 = vperm.xlu1 %1458, %v979_v54  }
  0x47   :  { %1004 = vperm.xlu0 %1457, %v978_v55  }
  0x4a   :  { %1019 = vperm.xlu1 %1458, %v981_v56  }
  0x4b   :  { %1014 = vperm.xlu0 %1457, %v980_v57  }
  0x4e   :  { %1029 = vperm.xlu1 %1458, %v983_v58  }
  0x4f   :  { %1024 = vperm.xlu0 %1457, %v982_v59  }
  0x52   :  { %1039 = vperm.xlu1 %1458, %v985_v60  }
  0x53   :  { %1034 = vperm.xlu0 %1457, %v984_v61  }
  0x56   :  { %1049 = vperm.xlu1 %1458, %v987_v62  }
  0x57   :  { %1044 = vperm.xlu0 %1457, %v986_v63  }
  0x5a   :  { %1059 = vperm.xlu1 %1458, %v989_v0  }
  0x5b   :  { %1054 = vperm.xlu0 %1457, %v988_v1  }
  0x5e   :  { %1069 = vperm.xlu1 %1458, %v991_v2  }
  0x5f   :  { %1064 = vperm.xlu0 %1457, %v990_v3  }
  0x62   :  { %1123 = vperm.xlu1 %1458, %v1115_v4  }
  0x63   :  { %1118 = vperm.xlu0 %1457, %v1114_v5  }
  0x81   :  { %v382_v8 = vpop.permute.xlu1 %381 }
  0x82   :  { %v76_v9 = vpop.permute.xlu0 %75 }
  0x85   :  { %v387_v10 = vpop.permute.xlu1 %386 }
  0x86   :  { %v81_v11 = vpop.permute.xlu0 %80 }
  0x89   :  { %v91_v12 = vpop.permute.xlu1 %90 }
  0x8a   :  { %v86_v13 = vpop.permute.xlu0 %85 }
  0x8d   :  { %v397_v14 = vpop.permute.xlu1 %396 }
  0x8e   :  { %v392_v15 = vpop.permute.xlu0 %391 }
  0x91   :  { %v101_v16 = vpop.permute.xlu1 %100 }
  0x92   :  { %v96_v17 = vpop.permute.xlu0 %95 }
  0x95   :  { %v1887_v18 = vpop.permute.xlu1 %406 }
  0x96   :  { %v402_v19 = vpop.permute.xlu0 %401 }
  0x99   :  { %v111_v20 = vpop.permute.xlu1 %110 }
  0x9a   :  { %v106_v21 = vpop.permute.xlu0 %105 }
  0x9d   :  { %v417_v22 = vpop.permute.xlu1 %416 }
  0x9e   :  { %v412_v23 = vpop.permute.xlu0 %411 }
  0xa1   :  { %v1889_v24 = vpop.permute.xlu1 %120 }
  0xa2   :  { %v1891_v25 = vpop.permute.xlu0 %115 }
  0xa5   :  { %v1893_v26 = vpop.permute.xlu1 %426 }
  0xa6   :  { %v1895_v27 = vpop.permute.xlu0 %421 }
  0xa9   :  { %v1897_v28 = vpop.permute.xlu1 %130 }
  0xaa   :  { %v126_v29 = vpop.permute.xlu0 %125 }
  0xad   :  { %v1899_v30 = vpop.permute.xlu1 %436 }
  0xae   :  { %v1901_v31 = vpop.permute.xlu0 %431 }
  0xb1   :  { %v1903_v32 = vpop.permute.xlu1 %140 }
  0xb2   :  { %v1905_v37 = vpop.permute.xlu0 %135 }
  0xb5   :  { %v1907_v50 = vpop.permute.xlu1 %446 }
  0xb6   :  { %v1909_v51 = vpop.permute.xlu0 %441 }
  0xb9   :  { %v1912_v7 = vpop.permute.xlu1 %150 }
  0xdb   :  { %v1321_v33 = vpop.f32.mrb[0].mxu0 }
  0xdc   :  { %v267_v34 = vadd.f32 %v1321_v33, %v86_v13  ;;  %v1339_v35 = vpop.f32.mrb[0].mxu1  ;;  %v258_v36 = vpop.f32.mrb[1].mxu0 }
  0xdd   :  { %v576_v38 = vadd.f32 %v1339_v35, %v392_v15  ;;  %v259_v39 = vadd.f32 %v258_v36, %v76_v9  ;;  %v567_v40 = vpop.f32.mrb[1].mxu1  ;;  %v1322_v42 = vpop.f32.mrb[2].mxu0 }
  0xde   :  { %1494 = vtanh.f32 %v267_v34  ;;  %v568_v41 = vadd.f32 %v567_v40, %v382_v8  ;;  %v270_v43 = vadd.f32 %v1322_v42, %v91_v12  ;;  %v1340_v44 = vpop.f32.mrb[2].mxu1  ;;  %v261_v45 = vpop.f32.mrb[3].mxu0 }
  0xdf   :  { %1496 = vtanh.f32 %v576_v38  ;;  %v579_v46 = vadd.f32 %v1340_v44, %v397_v14  ;;  %v262_v47 = vadd.f32 %v261_v45, %v81_v11  ;;  %v570_v48 = vpop.f32.mrb[3].mxu1  ;;  %v146_v9 = vpop.permute.xlu0 %145 }
  0xe0   :  { %1498 = vtanh.f32 %v259_v39  ;;  %v571_v49 = vadd.f32 %v570_v48, %v387_v10  ;;  %v457_v42 = vpop.permute.xlu1 %456 }
  0xe1   :  { %1500 = vtanh.f32 %v568_v41 }
  0xe2   :  { %1502 = vtanh.f32 %v270_v43 }
  0xe3   :  { %1504 = vtanh.f32 %v579_v46  ;;  %v1325_v52 = vpop.f32.mrb[4].mxu0  ;;  %v452_v44 = vpop.permute.xlu0 %451 }
  0xe4   :  { %1506 = vtanh.f32 %v262_v47  ;;  %v283_v53 = vadd.f32 %v1325_v52, %v106_v21  ;;  %v1343_v54 = vpop.f32.mrb[4].mxu1  ;;  %v274_v55 = vpop.f32.mrb[5].mxu0 }
  0xe5   :  { %1508 = vtanh.f32 %v571_v49  ;;  %v592_v56 = vadd.f32 %v1343_v54, %v412_v23  ;;  %v275_v57 = vadd.f32 %v274_v55, %v96_v17  ;;  %v583_v58 = vpop.f32.mrb[5].mxu1  ;;  %v1326_v59 = vpop.f32.mrb[6].mxu0 }
  0xe6   :  { %1510 = vtanh.f32 %v283_v53  ;;  %v584_v60 = vadd.f32 %v583_v58, %v402_v19  ;;  %v286_v61 = vadd.f32 %v1326_v59, %v111_v20  ;;  %v1344_v62 = vpop.f32.mrb[6].mxu1  ;;  %v277_v63 = vpop.f32.mrb[7].mxu0 }
  0xe7   :  { %1512 = vtanh.f32 %v592_v56  ;;  %v595_v0 = vadd.f32 %v1344_v62, %v417_v22  ;;  %v586_v1 = vpop.f32.mrb[7].mxu1  ;;  %v278_v3 = vadd.f32 %v277_v63, %v101_v16 }
  0xe8   :  { %v1495_v2 = vpop.eup %1494  ;;  %1514 = vtanh.f32 %v275_v57  ;;  %v587_v5 = vadd.f32 %v586_v1, %v1887_v18 }
  0xe9   :  { %v1497_v4 = vpop.eup %1496  ;;  %1516 = vtanh.f32 %v584_v60 }
  0xea   :  { %v1499_v6 = vpop.eup %1498  ;;  %1518 = vtanh.f32 %v286_v61 }
  0xeb   :  { %v1501_v8 = vpop.eup %1500  ;;  %1520 = vtanh.f32 %v595_v0  ;;  %v1329_v10 = vpop.f32.mrb[8].mxu0 }
  0xec   :  { %v1503_v11 = vpop.eup %1502  ;;  %1522 = vtanh.f32 %v278_v3  ;;  %v299_v12 = vadd.f32 %v1329_v10, %v126_v29  ;;  %v1347_v13 = vpop.f32.mrb[8].mxu1 }
  0xed   :  { %v290_v14 = vpop.f32.mrb[9].mxu0  ;;  %v1505_v15 = vpop.eup %1504  ;;  %1524 = vtanh.f32 %v587_v5  ;;  %v608_v16 = vadd.f32 %v1347_v13, %v1901_v31  ;;  %v338_v20 = vpack.c.bf16 %v1503_v11, %v1495_v2 }
  0xee   :  { %v291_v17 = vadd.f32 %v290_v14, %v1891_v25  ;;  %v599_v18 = vpop.f32.mrb[9].mxu1  ;;  %v1330_v19 = vpop.f32.mrb[10].mxu0  ;;  %1526 = vtanh.f32 %v299_v12  ;;  %v647_v29 = vpack.c.bf16 %v1505_v15, %v1497_v4 }
  0xef   :  { %v1507_v21 = vpop.eup %1506  ;;  %v600_v22 = vadd.f32 %v599_v18, %v1895_v27  ;;  %v302_v23 = vadd.f32 %v1330_v19, %v1897_v28  ;;  %v1348_v33 = vpop.f32.mrb[10].mxu1  ;;  %1528 = vtanh.f32 %v608_v16 }
  0xf0   :  { %v293_v34 = vpop.f32.mrb[11].mxu0  ;;  %v1509_v35 = vpop.eup %1508  ;;  %v611_v36 = vadd.f32 %v1348_v33, %v1899_v30  ;;  %v337_v31 = vpack.c.bf16 %v1507_v21, %v1499_v6  ;;  %1530 = vtanh.f32 %v291_v17  ;;  %v1480_v33 = vld [vmem:[%s1998_s6 + $0x8] sm:$0xff]  }
  0xf1   :  { %v602_v38 = vpop.f32.mrb[11].mxu1  ;;  %v1511_v39 = vpop.eup %1510  ;;  %v294_v25 = vadd.f32 %v293_v34, %v1889_v24  ;;  %v646_v40 = vpack.c.bf16 %v1509_v35, %v1501_v8  ;;  %1532 = vtanh.f32 %v600_v22  ;;  %v1479_v34 = vld [vmem:[%s1997_s7 + $0x8] sm:$0xff]   ;;  %v1481_v35 = vld [vmem:[%s1997_s7 + $0x10] sm:$0xff]  }
  0xf2   :  { %v1513_v41 = vpop.eup %1512  ;;  %v603_v27 = vadd.f32 %v602_v38, %v1893_v26  ;;  %1385 = vmatprep.subr.bf16.mxu0 %v337_v31  ;;  %1534 = vtanh.f32 %v302_v23  ;;  %v1483_v38 = vld [vmem:[%s1997_s7 + $0x18] sm:$0xff]  }
  0xf3   :  { %v1515_v28 = vpop.eup %1514  ;;  %1353 = vmatprep.subr.bf16.mxu1 %v646_v40  ;;  %1386 = vmatpush3.bf16.msra.mxu0 %v337_v31  ;;  %1536 = vtanh.f32 %v611_v36  ;;  %v1333_v30 = vpop.f32.mrb[12].mxu0  ;;  %v1484_v36 = vld [vmem:[%s1998_s6 + $0x18] sm:$0xff]   ;;  %v1486_v31 = vld [vmem:[%s1998_s6 + $0x20] sm:$0xff]  }
  0xf4   :  { %v1517_v43 = vpop.eup %1516  ;;  %1354 = vmatpush3.bf16.msra.mxu1 %v646_v40  ;;  %1387 = vmatprep.subr.bf16.mxu0 %v338_v20  ;;  %1538 = vtanh.f32 %v294_v25  ;;  %v315_v24 = vadd.f32 %v1333_v30, %v146_v9  ;;  %v1351_v46 = vpop.f32.mrb[12].mxu1  ;;  %v1488_v25 = vld [vmem:[%s1998_s6 + $0x28] sm:$0xff]  }
  0xf5   :  { %v1519_v45 = vpop.eup %1518  ;;  %1355 = vmatprep.subr.bf16.mxu1 %v647_v29  ;;  %v306_v47 = vpop.f32.mrb[13].mxu0  ;;  %1540 = vtanh.f32 %v603_v27  ;;  %v624_v26 = vadd.f32 %v1351_v46, %v452_v44  ;;  %v1487_v40 = vld [vmem:[%s1997_s7 + $0x28] sm:$0xff]   ;;  %v1489_v27 = vld [vmem:[%s1997_s7 + $0x30] sm:$0xff]  }
  0xf6   :  { %v1521_v48 = vpop.eup %1520  ;;  %v307_v49 = vadd.f32 %v306_v47, %v1905_v37  ;;  %v615_v52 = vpop.f32.mrb[13].mxu1  ;;  %v340_v54 = vpack.c.bf16 %v1519_v45, %v1511_v39  ;;  %1542 = vtanh.f32 %v315_v24  ;;  %v1485_v39 = vld [vmem:[%s1997_s7 + $0x20] sm:$0xff]  }
  0xf7   :  { %v1334_v53 = vpop.f32.mrb[14].mxu0  ;;  %v1523_v55 = vpop.eup %1522  ;;  %1388 = vmatpush3.bf16.msra.mxu0 %v338_v20  ;;  %v616_v56 = vadd.f32 %v615_v52, %v1909_v51  ;;  %v649_v60 = vpack.c.bf16 %v1521_v48, %v1513_v41  ;;  %1544 = vtanh.f32 %v624_v26  ;;  %v1490_v41 = vld [vmem:[%s1998_s6 + $0x30] sm:$0xff]  }
  0xf8   :  { %v318_v57 = vadd.f32 %v1334_v53, %v1912_v7  ;;  %v1352_v58 = vpop.f32.mrb[14].mxu1  ;;  %v309_v59 = vpop.f32.mrb[15].mxu0  ;;  %1356 = vmatpush3.bf16.msra.mxu1 %v647_v29  ;;  %v339_v0 = vpack.c.bf16 %v1523_v55, %v1515_v28  ;;  %1546 = vtanh.f32 %v307_v49  ;;  %v1482_v29 = vld [vmem:[%s1998_s6 + $0x10] sm:$0xff]   ;;  %v1492_v28 = vld [vmem:[%s1998_s6 + $0x38] sm:$0xff]  }
  0xf9   :  { %v1525_v61 = vpop.eup %1524  ;;  %v627_v62 = vadd.f32 %v1352_v58, %v457_v42  ;;  %v618_v63 = vpop.f32.mrb[15].mxu1  ;;  %v310_v1 = vadd.f32 %v309_v59, %v1903_v32  ;;  %1548 = vtanh.f32 %v616_v56  ;;  %v1491_v42 = vld [vmem:[%s1997_s7 + $0x38] sm:$0xff]  }
  0xfa   :  { %v1527_v37 = vpop.eup %1526  ;;  %v648_v2 = vpack.c.bf16 %v1525_v61, %v1517_v43  ;;  %v619_v51 = vadd.f32 %v618_v63, %v1907_v50  ;;  %1389 = vmatprep.subr.bf16.mxu0 %v339_v0  ;;  %1550 = vtanh.f32 %v318_v57  ;;  %v1599_v43 = vmov 0.0   ;;  %v995_v44 = vpop.permute.xlu0 %994 }
  0xfb   :  { %v1529_v3 = vpop.eup %1528  ;;  %1390 = vmatpush3.bf16.msra.mxu0 %v339_v0  ;;  %1552 = vtanh.f32 %v627_v62  ;;  %v1000_v30 = vpop.permute.xlu1 %999 }
  0xfc   :  { %v1531_v4 = vpop.eup %1530  ;;  %1357 = vmatprep.subr.bf16.mxu1 %v648_v2  ;;  %1391 = vmatprep.subr.bf16.mxu0 %v340_v54  ;;  %1554 = vtanh.f32 %v310_v1 }
  0xfd   :  { %v1533_v5 = vpop.eup %1532  ;;  %1358 = vmatpush3.bf16.msra.mxu1 %v648_v2  ;;  %1556 = vtanh.f32 %v619_v51 }
  0xfe   :  { %v1535_v6 = vpop.eup %1534  ;;  %1359 = vmatprep.subr.bf16.mxu1 %v649_v60  ;;  %v1005_v45 = vpop.permute.xlu0 %1004 }
  0xff   :  { %v1537_v7 = vpop.eup %1536  ;;  %v342_v32 = vpack.c.bf16 %v1535_v6, %v1527_v37  ;;  %1392 = vmatpush3.bf16.msra.mxu0 %v340_v54  ;;  %v1010_v24 = vpop.permute.xlu1 %1009 }
 0x100   :  { %v1539_v8 = vpop.eup %1538  ;;  %v651_v9 = vpack.c.bf16 %v1537_v7, %v1529_v3 }
 0x101   :  { %v1541_v10 = vpop.eup %1540  ;;  %1360 = vmatpush3.bf16.msra.mxu1 %v649_v60  ;;  %v341_v50 = vpack.c.bf16 %v1539_v8, %v1531_v4 }
 0x102   :  { %v1543_v11 = vpop.eup %1542  ;;  %v650_v12 = vpack.c.bf16 %v1541_v10, %v1533_v5  ;;  %v1015_v46 = vpop.permute.xlu0 %1014 }
 0x103   :  { %v1545_v13 = vpop.eup %1544  ;;  %1393 = vmatprep.subr.bf16.mxu0 %v341_v50  ;;  %v1020_v47 = vpop.permute.xlu1 %1019 }
 0x104   :  { %v1547_v14 = vpop.eup %1546  ;;  %1361 = vmatprep.subr.bf16.mxu1 %v650_v12  ;;  %1394 = vmatpush3.bf16.msra.mxu0 %v341_v50 }
 0x105   :  { %v1549_v15 = vpop.eup %1548  ;;  %1362 = vmatpush3.bf16.msra.mxu1 %v650_v12  ;;  %1395 = vmatprep.subr.bf16.mxu0 %v342_v32 }
 0x106   :  { %v1551_v16 = vpop.eup %1550  ;;  %1363 = vmatprep.subr.bf16.mxu1 %v651_v9  ;;  %v1025_v48 = vpop.permute.xlu0 %1024 }
 0x107   :  { %v1553_v17 = vpop.eup %1552  ;;  %v344_v18 = vpack.c.bf16 %v1551_v16, %v1543_v11  ;;  %v1030_v26 = vpop.permute.xlu1 %1029 }
 0x108   :  { %v1555_v19 = vpop.eup %1554  ;;  %1396 = vmatpush3.bf16.msra.mxu0 %v342_v32  ;;  %v653_v20 = vpack.c.bf16 %v1553_v17, %v1545_v13 }
 0x109   :  { %v1557_v21 = vpop.eup %1556  ;;  %1364 = vmatpush3.bf16.msra.mxu1 %v651_v9  ;;  %v343_v22 = vpack.c.bf16 %v1555_v19, %v1547_v14 }
 0x10a   :  { %v652_v23 = vpack.c.bf16 %v1557_v21, %v1549_v15  ;;  %v1970_v49 = vpop.permute.xlu0 %1034 }
 0x10b   :  { %1397 = vmatprep.subr.bf16.mxu0 %v343_v22  ;;  %v1040_v2 = vpop.permute.xlu1 %1039 }
 0x10c   :  { %1365 = vmatprep.subr.bf16.mxu1 %v652_v23  ;;  %1398 = vmatpush3.bf16.msra.mxu0 %v343_v22 }
 0x10d   :  { %1366 = vmatpush3.bf16.msra.mxu1 %v652_v23  ;;  %1399 = vmatprep.subr.bf16.mxu0 %v344_v18 }
 0x10e   :  { %1367 = vmatprep.subr.bf16.mxu1 %v653_v20  ;;  %v1045_v51 = vpop.permute.xlu0 %1044 }
 0x10f   :  { %v1050_v17 = vpop.permute.xlu1 %1049 }
 0x110   :  { %1400 = vmatpush3.bf16.msra.mxu0 %v344_v18 }
 0x111   :  { %1368 = vmatpush3.bf16.msra.mxu1 %v653_v20 }
 0x112   :  { %1417 = vmatprep.subr.bf16.mxu1 %v1599_v43  ;;  %v1055_v20 = vpop.permute.xlu0 %1054 }
 0x113   :  { %1402 = vmatmul.mubr.bf16.vlgmr.msra.gmra.mrb[16].mxu0 %v1480_v33 }
 0x114   :  { %1370 = vmatmul.mubr.bf16.vlgmr.msra.gmra.mrb[16].mxu1 %v1479_v34  ;;  %1405 = vmatprep.mubr.bf16.mxu0 %v1482_v29 }
 0x115   :  { %1373 = vmatprep.mubr.bf16.mxu1 %v1481_v35 }
 0x11b   :  { %1406 = vmatmul.mubr.bf16.gmra.mrb[20].mxu0 %v1484_v36 }
 0x11c   :  { %1374 = vmatmul.mubr.bf16.gmra.mrb[20].mxu1 %v1483_v38  ;;  %1409 = vmatprep.mubr.bf16.mxu0 %v1486_v31 }
 0x11d   :  { %1377 = vmatprep.mubr.bf16.mxu1 %v1485_v39 }
 0x123   :  { %1410 = vmatmul.mubr.bf16.gmra.mrb[24].mxu0 %v1488_v25 }
 0x124   :  { %1378 = vmatmul.mubr.bf16.gmra.mrb[24].mxu1 %v1487_v40  ;;  %1413 = vmatprep.mubr.bf16.mxu0 %v1490_v41 }
 0x125   :  { %1381 = vmatprep.mubr.bf16.mxu1 %v1489_v27 }
 0x12b   :  { %1414 = vmatmul.mubr.bf16.gmra.mrb[28].mxu0 %v1492_v28 }
 0x12c   :  { %1382 = vmatmul.mubr.bf16.gmra.mrb[28].mxu1 %v1491_v42 }
 0x12d   :  { %1433 = vmatprep.mubr.msk.bf16.mxu1 %vm1600_vm3, %v1599_v43 }
 0x1e6   :  { %v1403_v52 = vpop.f32.mrb[16].mxu0 }
 0x1e7   :  { %v1371_v53 = vpop.f32.mrb[16].mxu1  ;;  %v913_v54 = vpop.f32.mrb[17].mxu0 }
 0x1e8   :  { %v922_v55 = vadd.f32 %v1403_v52, %v1371_v53  ;;  %v768_v56 = vpop.f32.mrb[17].mxu1  ;;  %v1404_v57 = vpop.f32.mrb[18].mxu0 }
 0x1e9   :  { %v914_v58 = vadd.f32 %v913_v54, %v768_v56  ;;  %v1372_v59 = vpop.f32.mrb[18].mxu1  ;;  %v916_v60 = vpop.f32.mrb[19].mxu0 }
 0x1ea   :  { %v1074_v61 = vadd.f32 %v1005_v45, %v922_v55  ;;  %v925_v62 = vadd.f32 %v1404_v57, %v1372_v59  ;;  %v771_v63 = vpop.f32.mrb[19].mxu1 }
 0x1eb   :  { %v1072_v0 = vadd.f32 %v995_v44, %v914_v58  ;;  %v917_v37 = vadd.f32 %v916_v60, %v771_v63 }
 0x1ec   :  { %1558 = vtanh.f32 %v1074_v61  ;;  %v1075_v1 = vadd.f32 %v1010_v24, %v925_v62  ;;  %v1060_v24 = vpop.permute.xlu1 %1059 }
 0x1ed   :  { %1560 = vtanh.f32 %v1072_v0  ;;  %v1073_v3 = vadd.f32 %v1000_v30, %v917_v37 }
 0x1ee   :  { %1562 = vtanh.f32 %v1075_v1  ;;  %v1407_v4 = vpop.f32.mrb[20].mxu0 }
 0x1ef   :  { %1564 = vtanh.f32 %v1073_v3  ;;  %v1375_v5 = vpop.f32.mrb[20].mxu1  ;;  %v929_v6 = vpop.f32.mrb[21].mxu0 }
 0x1f0   :  { %v938_v7 = vadd.f32 %v1407_v4, %v1375_v5  ;;  %v784_v32 = vpop.f32.mrb[21].mxu1  ;;  %v1408_v8 = vpop.f32.mrb[22].mxu0 }
 0x1f1   :  { %v930_v9 = vadd.f32 %v929_v6, %v784_v32  ;;  %v1376_v10 = vpop.f32.mrb[22].mxu1  ;;  %v932_v50 = vpop.f32.mrb[23].mxu0 }
 0x1f2   :  { %v1078_v11 = vadd.f32 %v1025_v48, %v938_v7  ;;  %v941_v12 = vadd.f32 %v1408_v8, %v1376_v10  ;;  %v787_v13 = vpop.f32.mrb[23].mxu1  ;;  %v1065_v48 = vpop.permute.xlu0 %1064 }
 0x1f3   :  { %v1076_v14 = vadd.f32 %v1015_v46, %v930_v9  ;;  %v933_v15 = vadd.f32 %v932_v50, %v787_v13 }
 0x1f4   :  { %1566 = vtanh.f32 %v1078_v11  ;;  %v1079_v16 = vadd.f32 %v1030_v26, %v941_v12 }
 0x1f5   :  { %1568 = vtanh.f32 %v1076_v14  ;;  %v1077_v18 = vadd.f32 %v1020_v47, %v933_v15 }
 0x1f6   :  { %v1559_v19 = vpop.eup %1558  ;;  %1570 = vtanh.f32 %v1079_v16  ;;  %v1411_v21 = vpop.f32.mrb[24].mxu0  ;;  %v1493_v16 = vld [vmem:[%s1999_s9] sm:$0x3f]  }
 0x1f7   :  { %v1561_v22 = vpop.eup %1560  ;;  %1572 = vtanh.f32 %v1077_v18  ;;  %v1379_v23 = vpop.f32.mrb[24].mxu1 }
 0x1f8   :  { %v945_v33 = vpop.f32.mrb[25].mxu0  ;;  %v1563_v34 = vpop.eup %1562  ;;  %v954_v29 = vadd.f32 %v1411_v21, %v1379_v23 }
 0x1f9   :  { %v800_v35 = vpop.f32.mrb[25].mxu1  ;;  %v1412_v36 = vpop.f32.mrb[26].mxu0  ;;  %v1105_v40 = vpack.c.bf16 %v1563_v34, %v1559_v19 }
 0x1fa   :  { %v1565_v38 = vpop.eup %1564  ;;  %v946_v31 = vadd.f32 %v945_v33, %v800_v35  ;;  %v1380_v39 = vpop.f32.mrb[26].mxu1  ;;  %v1082_v41 = vadd.f32 %v1045_v51, %v954_v29 }
 0x1fb   :  { %v948_v25 = vpop.f32.mrb[27].mxu0  ;;  %v957_v27 = vadd.f32 %v1412_v36, %v1380_v39  ;;  %v803_v28 = vpop.f32.mrb[27].mxu1  ;;  %v1104_v42 = vpack.c.bf16 %v1565_v38, %v1561_v22 }
 0x1fc   :  { %v1080_v44 = vadd.f32 %v1970_v49, %v946_v31  ;;  %v949_v30 = vadd.f32 %v948_v25, %v803_v28  ;;  %1574 = vtanh.f32 %v1082_v41 }
 0x1fd   :  { %v1083_v45 = vadd.f32 %v1050_v17, %v957_v27  ;;  %1418 = vmatpush3.bf16.msra.mxu1 %v1104_v42  ;;  %v1119_v17 = vpop.permute.xlu0 %1118 }
 0x1fe   :  { %1576 = vtanh.f32 %v1080_v44  ;;  %v1081_v46 = vadd.f32 %v1040_v2, %v949_v30  ;;  %1419 = vmatprep.subr.bf16.mxu1 %v1599_v43  ;;  %v1567_v47 = vpop.eup %1566  ;;  %v1415_v26 = vpop.f32.mrb[28].mxu0 }
 0x1ff   :  { %1578 = vtanh.f32 %v1083_v45  ;;  %v1569_v52 = vpop.eup %1568  ;;  %v1383_v53 = vpop.f32.mrb[28].mxu1 }
 0x200   :  { %1580 = vtanh.f32 %v1081_v46  ;;  %v961_v54 = vpop.f32.mrb[29].mxu0  ;;  %v1571_v55 = vpop.eup %1570  ;;  %v970_v56 = vadd.f32 %v1415_v26, %v1383_v53 }
 0x201   :  { %v816_v49 = vpop.f32.mrb[29].mxu1  ;;  %1420 = vmatpush3.bf16.msra.mxu1 %v1105_v40  ;;  %v1416_v57 = vpop.f32.mrb[30].mxu0  ;;  %v1107_v62 = vpack.c.bf16 %v1571_v55, %v1567_v47 }
 0x202   :  { %v1573_v58 = vpop.eup %1572  ;;  %v962_v59 = vadd.f32 %v961_v54, %v816_v49  ;;  %v1384_v60 = vpop.f32.mrb[30].mxu1  ;;  %1421 = vmatprep.subr.bf16.mxu1 %v1599_v43  ;;  %v1086_v63 = vadd.f32 %v1065_v48, %v970_v56 }
 0x203   :  { %v964_v61 = vpop.f32.mrb[31].mxu0  ;;  %v973_v0 = vadd.f32 %v1416_v57, %v1384_v60  ;;  %v819_v37 = vpop.f32.mrb[31].mxu1  ;;  %v1106_v1 = vpack.c.bf16 %v1573_v58, %v1569_v52 }
 0x204   :  { %v1070_v2 = vpop.permute.xlu1 %1069  ;;  %v1084_v3 = vadd.f32 %v1055_v20, %v962_v59  ;;  %v965_v51 = vadd.f32 %v964_v61, %v819_v37  ;;  %1582 = vtanh.f32 %v1086_v63 }
 0x205   :  { %v1087_v4 = vadd.f32 %v1070_v2, %v973_v0  ;;  %1422 = vmatpush3.bf16.msra.mxu1 %v1106_v1 }
 0x206   :  { %1584 = vtanh.f32 %v1084_v3  ;;  %v1085_v5 = vadd.f32 %v1060_v24, %v965_v51  ;;  %1423 = vmatprep.subr.bf16.mxu1 %v1599_v43  ;;  %v1575_v6 = vpop.eup %1574 }
 0x207   :  { %1586 = vtanh.f32 %v1087_v4 }
 0x208   :  { %v1577_v7 = vpop.eup %1576  ;;  %1588 = vtanh.f32 %v1085_v5  ;;  %v1124_v21 = vpop.permute.xlu1 %1123 }
 0x209   :  { %v1579_v32 = vpop.eup %1578  ;;  %1424 = vmatpush3.bf16.msra.mxu1 %v1107_v62 }
 0x20a   :  { %v1581_v8 = vpop.eup %1580  ;;  %1425 = vmatprep.subr.bf16.mxu1 %v1599_v43  ;;  %v1109_v9 = vpack.c.bf16 %v1579_v32, %v1575_v6 }
 0x20b   :  { %v1108_v10 = vpack.c.bf16 %v1581_v8, %v1577_v7 }
 0x20d   :  { %1426 = vmatpush3.bf16.msra.mxu1 %v1108_v10 }
 0x20e   :  { %1427 = vmatprep.subr.bf16.mxu1 %v1599_v43  ;;  %v1583_v50 = vpop.eup %1582 }
 0x210   :  { %v1585_v11 = vpop.eup %1584 }
 0x211   :  { %v1587_v12 = vpop.eup %1586  ;;  %1428 = vmatpush3.bf16.msra.mxu1 %v1109_v9 }
 0x212   :  { %v1589_v13 = vpop.eup %1588  ;;  %1429 = vmatprep.subr.bf16.mxu1 %v1599_v43  ;;  %v1111_v14 = vpack.c.bf16 %v1587_v12, %v1583_v50 }
 0x213   :  { %v1110_v15 = vpack.c.bf16 %v1589_v13, %v1585_v11 }
 0x215   :  { %1430 = vmatpush3.bf16.msra.mxu1 %v1110_v15 }
 0x216   :  { %1431 = vmatprep.subr.bf16.mxu1 %v1599_v43 }
 0x219   :  { %1432 = vmatpush3.bf16.msra.mxu1 %v1111_v14 }
 0x21c   :  { %1434 = vmatmul.mubr.bf16.vlgmr.msra.gmra.mrb[32].mxu1 %v1493_v16 }
 0x2ef   :  { %v1166_v18 = vpop.f32.mrb[32].mxu1 }
 0x2f0   :  { %v1167_v19 = vadd.f32 %v1166_v18, %v1119_v17  ;;  %v1435_v20 = vpop.f32.mrb[33].mxu1 }
 0x2f1   :  { %v1169_v22 = vpop.f32.mrb[34].mxu1 }
 0x2f2   :  { %v1252_v23 = vmul.f32 -1.442695, %v1167_v19  ;;  %v1170_v33 = vadd.f32 %v1169_v22, %v1124_v21  ;;  %v1436_v34 = vpop.f32.mrb[35].mxu1 }
 0x2f4   :  { %1590 = vpow2.f32 %v1252_v23  ;;  %v1253_v29 = vmul.f32 -1.442695, %v1170_v33 }
 0x2f6   :  { %1592 = vpow2.f32 %v1253_v29 }
 0x2fe   :  { %v1591_v35 = vpop.eup %1590 }
 0x2ff   :  { %v1179_v43 = vadd.f32 1.0, %v1591_v35 }
 0x300   :  { %v1593_v36 = vpop.eup %1592 }
 0x301   :  { %1594 = vrcp.f32 %v1179_v43  ;;  %v1180_v38 = vadd.f32 1.0, %v1593_v36 }
 0x303   :  { %1596 = vrcp.f32 %v1180_v38 }
 0x30b   :  { %v1595_v31 = vpop.eup %1594 }
 0x30c   :  { %v1256_v39 = vpack.c.bf16 %v1595_v31, %v1595_v31 }
 0x30d   :  { %v1597_v25 = vpop.eup %1596 }
 0x30e   :  { %1194 = vst.msk [vmem:[%s2000_s11] sm:$0xf] %vm1193_vm4, %v1256_v39  ;;  %v1257_v40 = vpack.c.bf16 %v1597_v25, %v1597_v25 }
 0x310   :  { %1196 = vst.msk [vmem:[%s2000_s11 + $0x4] sm:$0x3] %vm1195_vm5, %v1257_v40 }

</bundles_post_ra>
